<compile_context>
chip_gen: v7x
topology: tpu7x:2x2x1
jax: 0.10.0
libtpu: 0.0.40
codegen_flags: <defaults>
</compile_context>

<pallas_src>
import functools
import numpy as np

import jax
import jax.numpy as jnp
from jax.experimental import pallas as pl
from jax.experimental.pallas import tpu as pltpu


def _attn_pool_kernel(kl_ref,                                   # scalar prefetch: (B,) int32 in SMEM
                      q_ref, k_ref,
                      w1q_ref, w1k_ref, w1d_ref, w1p_ref, b1_ref,
                      w2_ref, b2_ref, w3_ref, b3_ref,
                      out_ref,
                      acc_ref):
    b = pl.program_id(0)
    t = pl.program_id(1)

    @pl.when(t == 0)
    def _():
        acc_ref[...] = jnp.zeros_like(acc_ref)

    f32 = jnp.float32
    q = q_ref[0].astype(f32)          # (1, E)
    keys = k_ref[0].astype(f32)       # (BT, E)
    bt = keys.shape[0]

    # LocalActivationUnit:  concat([q, k, q-k, q*k]) @ W1  ==  split-weight sum.
    zq = jnp.dot(q, w1q_ref[...], preferred_element_type=f32)            # (1, H1)
    zk = jnp.dot(keys, w1k_ref[...], preferred_element_type=f32)         # (BT, H1)
    zd = jnp.dot(q - keys, w1d_ref[...], preferred_element_type=f32)     # (BT, H1)
    zp = jnp.dot(q * keys, w1p_ref[...], preferred_element_type=f32)     # (BT, H1)
    h1 = jax.nn.sigmoid(zq + zk + zd + zp + b1_ref[...])                 # (BT, H1)
    h2 = jax.nn.sigmoid(
        jnp.dot(h1, w2_ref[...], preferred_element_type=f32) + b2_ref[...])  # (BT, H2)
    score = jnp.dot(h2, w3_ref[...], preferred_element_type=f32) + b3_ref[...]  # (BT, 1)

    # Mask positions >= keys_length[b] (weight_normalization=False -> pad with 0).
    kl = kl_ref[b]
    pos = t * bt + jax.lax.broadcasted_iota(jnp.int32, (bt, 1), 0)
    w = jnp.where(pos < kl, score, 0.0)                                  # (BT, 1)

    # Weighted pooling of this sequence tile: accumulate sum_t w_t * keys_t.
    acc_ref[...] += jnp.sum(w * keys, axis=0, keepdims=True)             # (1, E)

    @pl.when(t == pl.num_programs(1) - 1)
    def _():
        out_ref[0] = acc_ref[...].astype(out_ref.dtype)


def attention_sequence_pooling(query, keys, keys_length, w1, b1, w2, b2, w3, b3):
    """JAX/Pallas equivalent of AttentionSequencePoolingLayer.forward with default flags."""
    B, T, E = keys.shape
    assert query.shape == (B, 1, E)
    H1 = w1.shape[1]
    H2 = w2.shape[1]
    assert w1.shape == (4 * E, H1) and w2.shape == (H1, H2) and w3.shape == (H2, 1)

    # Split W1 along its input axis so the kernel never concatenates the narrow
    # [q, k, q-k, q*k] feature axis:  concat(...) @ W1 == q@W1q + k@W1k + (q-k)@W1d + (q*k)@W1p
    w1q, w1k, w1d, w1p = w1[0:E], w1[E:2 * E], w1[2 * E:3 * E], w1[3 * E:4 * E]

    b1 = b1.reshape(1, H1)
    b2 = b2.reshape(1, H2)
    b3 = b3.reshape(1, 1)
    kl = keys_length.reshape(B).astype(jnp.int32)

    # Sequence-axis tile: full T for small sequences, otherwise a bounded tile so
    # the pipeline double-buffers keys from HBM and VMEM stays bounded (v7x: 64 MiB).
    BT = T if T <= 512 else 512
    assert T % BT == 0, "sequence length must be divisible by the sequence tile"
    grid = (B, T // BT)

    full2d = lambda b, t, kl: (0, 0)   # weights/biases resident across the whole grid

    out = pl.pallas_call(
        _attn_pool_kernel,
        out_shape=jax.ShapeDtypeStruct((B, 1, E), keys.dtype),
        grid_spec=pltpu.PrefetchScalarGridSpec(
            num_scalar_prefetch=1,
            grid=grid,
            in_specs=[
                pl.BlockSpec((1, 1, E), lambda b, t, kl: (b, 0, 0)),    # query
                pl.BlockSpec((1, BT, E), lambda b, t, kl: (b, t, 0)),   # keys (pipelined over T)
                pl.BlockSpec((E, H1), full2d),                          # W1[q rows]
                pl.BlockSpec((E, H1), full2d),                          # W1[k rows]
                pl.BlockSpec((E, H1), full2d),                          # W1[q-k rows]
                pl.BlockSpec((E, H1), full2d),                          # W1[q*k rows]
                pl.BlockSpec((1, H1), full2d),                          # b1
                pl.BlockSpec((H1, H2), full2d),                         # W2
                pl.BlockSpec((1, H2), full2d),                          # b2
                pl.BlockSpec((H2, 1), full2d),                          # W3
                pl.BlockSpec((1, 1), full2d),                           # b3
            ],
            out_specs=pl.BlockSpec((1, 1, E), lambda b, t, kl: (b, 0, 0)),
            scratch_shapes=[pltpu.VMEM((1, E), jnp.float32)],           # pooled accumulator
        ),
        compiler_params=pltpu.CompilerParams(
            dimension_semantics=("parallel", "arbitrary")),
    )(kl, query, keys, w1q, w1k, w1d, w1p, b1, w2, b2, w3, b3)
    return out


def _ref_forward(query, keys, keys_length, w1, b1, w2, b2, w3, b3):
    """Pure-JAX reference replicating the PyTorch forward (default flags)."""
    B, T, E = keys.shape
    queries = jnp.broadcast_to(query, (B, T, E))
    att_in = jnp.concatenate([queries, keys, queries - keys, queries * keys], axis=-1)
    h1 = jax.nn.sigmoid(att_in @ w1 + b1)
    h2 = jax.nn.sigmoid(h1 @ w2 + b2)
    score = h2 @ w3 + b3                                    # (B, T, 1)
    outputs = jnp.transpose(score, (0, 2, 1))               # (B, 1, T)
    mask = (jnp.arange(T)[None, :] < keys_length.reshape(B, 1))[:, None, :]
    outputs = jnp.where(mask, outputs, 0.0)
    return jnp.matmul(outputs, keys)                        # (B, 1, E)


if __name__ == "__main__":
    key = jax.random.PRNGKey(0)
    B, T, E = 2, 8, 4            # (batch, seq len T, embedding_dim) -- module default embedding_dim=4
    H1, H2 = 80, 40              # att_hidden_units default (80, 40)

    ks = jax.random.split(key, 8)
    query = jax.random.normal(ks[0], (B, 1, E), dtype=jnp.float32)
    keys = jax.random.normal(ks[1], (B, T, E), dtype=jnp.float32)
    keys_length = jnp.array([[6], [3]], dtype=jnp.int32)     # (B, 1)

    w1 = jax.random.normal(ks[2], (4 * E, H1), dtype=jnp.float32) * 0.1
    b1 = jax.random.normal(ks[3], (H1,), dtype=jnp.float32) * 0.1
    w2 = jax.random.normal(ks[4], (H1, H2), dtype=jnp.float32) * 0.1
    b2 = jax.random.normal(ks[5], (H2,), dtype=jnp.float32) * 0.1
    w3 = jax.random.normal(ks[6], (H2, 1), dtype=jnp.float32) * 0.1
    b3 = jax.random.normal(ks[7], (1,), dtype=jnp.float32) * 0.1

    out = attention_sequence_pooling(query, keys, keys_length, w1, b1, w2, b2, w3, b3)
    out = jax.block_until_ready(out)

    ref = _ref_forward(query, keys, keys_length, w1, b1, w2, b2, w3, b3)
    assert out.shape == (B, 1, E), out.shape
    np.testing.assert_allclose(np.asarray(out), np.asarray(ref), rtol=1e-5, atol=1e-5)

    print("KERNEL_OK")
</pallas_src>

<mosaic_0001>
module attributes {stable_mosaic.version = 11 : i64} {
  func.func @_attn_pool_kernel(%arg0: i32, %arg1: i32, %arg2: memref<2xi32, #tpu.memory_space<smem>>, %arg3: memref<1x1x4xf32, #tpu.memory_space<vmem>>, %arg4: memref<1x8x4xf32, #tpu.memory_space<vmem>>, %arg5: memref<4x80xf32, #tpu.memory_space<vmem>>, %arg6: memref<4x80xf32, #tpu.memory_space<vmem>>, %arg7: memref<4x80xf32, #tpu.memory_space<vmem>>, %arg8: memref<4x80xf32, #tpu.memory_space<vmem>>, %arg9: memref<1x80xf32, #tpu.memory_space<vmem>>, %arg10: memref<80x40xf32, #tpu.memory_space<vmem>>, %arg11: memref<1x40xf32, #tpu.memory_space<vmem>>, %arg12: memref<40x1xf32, #tpu.memory_space<vmem>>, %arg13: memref<1x1xf32, #tpu.memory_space<vmem>>, %arg14: memref<1x1x4xf32, #tpu.memory_space<vmem>>, %arg15: memref<1x4xf32, #tpu.memory_space<vmem>>) attributes {dimension_semantics = [#tpu.dimension_semantics<parallel>, #tpu.dimension_semantics<arbitrary>], iteration_bounds = array<i64: 2, 1>, scalar_prefetch = 1 : i64, scratch_operands = 1 : i64, tpu.core_type = #tpu.core_type<tc>, window_params = [{transform_indices = @transform_0, window_bounds = array<i64: 1, 1, 4>}, {transform_indices = @transform_1, window_bounds = array<i64: 1, 8, 4>}, {pipeline_mode = #tpu.pipeline_mode<synchronous>, transform_indices = @transform_2, window_bounds = array<i64: 4, 80>}, {pipeline_mode = #tpu.pipeline_mode<synchronous>, transform_indices = @transform_3, window_bounds = array<i64: 4, 80>}, {pipeline_mode = #tpu.pipeline_mode<synchronous>, transform_indices = @transform_4, window_bounds = array<i64: 4, 80>}, {pipeline_mode = #tpu.pipeline_mode<synchronous>, transform_indices = @transform_5, window_bounds = array<i64: 4, 80>}, {pipeline_mode = #tpu.pipeline_mode<synchronous>, transform_indices = @transform_6, window_bounds = array<i64: 1, 80>}, {pipeline_mode = #tpu.pipeline_mode<synchronous>, transform_indices = @transform_7, window_bounds = array<i64: 80, 40>}, {pipeline_mode = #tpu.pipeline_mode<synchronous>, transform_indices = @transform_8, window_bounds = array<i64: 1, 40>}, {pipeline_mode = #tpu.pipeline_mode<synchronous>, transform_indices = @transform_9, window_bounds = array<i64: 40, 1>}, {pipeline_mode = #tpu.pipeline_mode<synchronous>, transform_indices = @transform_10, window_bounds = array<i64: 1, 1>}, {transform_indices = @transform_11, window_bounds = array<i64: 1, 1, 4>}]} {
    %c0_i32 = arith.constant 0 : i32
    %0 = arith.cmpi eq, %arg1, %c0_i32 : i32
    %1 = arith.extui %0 : i1 to i32
    %c0_i32_0 = arith.constant 0 : i32
    %2 = arith.cmpi ne, %1, %c0_i32_0 : i32
    scf.if %2 {
      %cst_39 = arith.constant 0.000000e+00 : f32
      %66 = vector.broadcast %cst_39 : f32 to vector<1x4xf32>
      %c0_40 = arith.constant 0 : index
      %c0_41 = arith.constant 0 : index
      %67 = vector.load %arg15[%c0_40, %c0_41] : memref<1x4xf32, #tpu.memory_space<vmem>>, vector<1x4xf32>
      tpu.vector_store %arg15[%c0_40, %c0_41], %66 {strides = array<i32>} : memref<1x4xf32, #tpu.memory_space<vmem>>, vector<1x4xf32>,
    } else {
    }
    %c0 = arith.constant 0 : index
    %c0_1 = arith.constant 0 : index
    %c0_2 = arith.constant 0 : index
    %3 = vector.load %arg3[%c0, %c0_1, %c0_2] : memref<1x1x4xf32, #tpu.memory_space<vmem>>, vector<1x1x4xf32>
    %4 = vector.shape_cast %3 : vector<1x1x4xf32> to vector<1x4xf32>
    %c0_3 = arith.constant 0 : index
    %c0_4 = arith.constant 0 : index
    %c0_5 = arith.constant 0 : index
    %5 = vector.load %arg4[%c0_3, %c0_4, %c0_5] : memref<1x8x4xf32, #tpu.memory_space<vmem>>, vector<1x8x4xf32>
    %6 = vector.shape_cast %5 : vector<1x8x4xf32> to vector<8x4xf32>
    %c0_6 = arith.constant 0 : index
    %c0_7 = arith.constant 0 : index
    %7 = vector.load %arg5[%c0_6, %c0_7] : memref<4x80xf32, #tpu.memory_space<vmem>>, vector<4x80xf32>
    %cst = arith.constant dense<0.000000e+00> : vector<1x80xf32>
    %8 = tpu.matmul %4, %7, %cst {dimension_numbers = #tpu.dot_dimension_numbers<[1], [0], [0], [1], [0, 0, 1, 1], [], []>} : vector<1x4xf32>, vector<4x80xf32>, vector<1x80xf32> -> vector<1x80xf32>
    %c0_8 = arith.constant 0 : index
    %c0_9 = arith.constant 0 : index
    %9 = vector.load %arg6[%c0_8, %c0_9] : memref<4x80xf32, #tpu.memory_space<vmem>>, vector<4x80xf32>
    %cst_10 = arith.constant dense<0.000000e+00> : vector<8x80xf32>
    %10 = tpu.matmul %6, %9, %cst_10 {dimension_numbers = #tpu.dot_dimension_numbers<[1], [0], [0], [1], [0, 0, 1, 1], [], []>} : vector<8x4xf32>, vector<4x80xf32>, vector<8x80xf32> -> vector<8x80xf32>
    %11 = vector.broadcast %4 : vector<1x4xf32> to vector<8x4xf32>
    %12 = arith.subf %11, %6 : vector<8x4xf32>
    %c0_11 = arith.constant 0 : index
    %c0_12 = arith.constant 0 : index
    %13 = vector.load %arg7[%c0_11, %c0_12] : memref<4x80xf32, #tpu.memory_space<vmem>>, vector<4x80xf32>
    %cst_13 = arith.constant dense<0.000000e+00> : vector<8x80xf32>
    %14 = tpu.matmul %12, %13, %cst_13 {dimension_numbers = #tpu.dot_dimension_numbers<[1], [0], [0], [1], [0, 0, 1, 1], [], []>} : vector<8x4xf32>, vector<4x80xf32>, vector<8x80xf32> -> vector<8x80xf32>
    %15 = vector.broadcast %4 : vector<1x4xf32> to vector<8x4xf32>
    %16 = arith.mulf %15, %6 : vector<8x4xf32>
    %c0_14 = arith.constant 0 : index
    %c0_15 = arith.constant 0 : index
    %17 = vector.load %arg8[%c0_14, %c0_15] : memref<4x80xf32, #tpu.memory_space<vmem>>, vector<4x80xf32>
    %cst_16 = arith.constant dense<0.000000e+00> : vector<8x80xf32>
    %18 = tpu.matmul %16, %17, %cst_16 {dimension_numbers = #tpu.dot_dimension_numbers<[1], [0], [0], [1], [0, 0, 1, 1], [], []>} : vector<8x4xf32>, vector<4x80xf32>, vector<8x80xf32> -> vector<8x80xf32>
    %19 = vector.broadcast %8 : vector<1x80xf32> to vector<8x80xf32>
    %20 = arith.addf %19, %10 : vector<8x80xf32>
    %21 = arith.addf %20, %14 : vector<8x80xf32>
    %22 = arith.addf %21, %18 : vector<8x80xf32>
    %c0_17 = arith.constant 0 : index
    %c0_18 = arith.constant 0 : index
    %23 = vector.load %arg9[%c0_17, %c0_18] : memref<1x80xf32, #tpu.memory_space<vmem>>, vector<1x80xf32>
    %24 = vector.broadcast %23 : vector<1x80xf32> to vector<8x80xf32>
    %25 = arith.addf %22, %24 : vector<8x80xf32>
    %26 = arith.negf %25 : vector<8x80xf32>
    %27 = math.exp %26 : vector<8x80xf32>
    %cst_19 = arith.constant 1.000000e+00 : f32
    %28 = vector.broadcast %cst_19 : f32 to vector<8x80xf32>
    %29 = arith.addf %28, %27 : vector<8x80xf32>
    %30 = arith.divf %28, %29 : vector<8x80xf32>
    %c0_20 = arith.constant 0 : index
    %c0_21 = arith.constant 0 : index
    %31 = vector.load %arg10[%c0_20, %c0_21] : memref<80x40xf32, #tpu.memory_space<vmem>>, vector<80x40xf32>
    %cst_22 = arith.constant dense<0.000000e+00> : vector<8x40xf32>
    %32 = tpu.matmul %30, %31, %cst_22 {dimension_numbers = #tpu.dot_dimension_numbers<[1], [0], [0], [1], [0, 0, 1, 1], [], []>} : vector<8x80xf32>, vector<80x40xf32>, vector<8x40xf32> -> vector<8x40xf32>
    %c0_23 = arith.constant 0 : index
    %c0_24 = arith.constant 0 : index
    %33 = vector.load %arg11[%c0_23, %c0_24] : memref<1x40xf32, #tpu.memory_space<vmem>>, vector<1x40xf32>
    %34 = vector.broadcast %33 : vector<1x40xf32> to vector<8x40xf32>
    %35 = arith.addf %32, %34 : vector<8x40xf32>
    %36 = arith.negf %35 : vector<8x40xf32>
    %37 = math.exp %36 : vector<8x40xf32>
    %cst_25 = arith.constant 1.000000e+00 : f32
    %38 = vector.broadcast %cst_25 : f32 to vector<8x40xf32>
    %39 = arith.addf %38, %37 : vector<8x40xf32>
    %40 = arith.divf %38, %39 : vector<8x40xf32>
    %c0_26 = arith.constant 0 : index
    %c0_27 = arith.constant 0 : index
    %41 = vector.load %arg12[%c0_26, %c0_27] : memref<40x1xf32, #tpu.memory_space<vmem>>, vector<40x1xf32>
    %cst_28 = arith.constant dense<0.000000e+00> : vector<8x1xf32>
    %42 = tpu.matmul %40, %41, %cst_28 {dimension_numbers = #tpu.dot_dimension_numbers<[1], [0], [0], [1], [0, 0, 1, 1], [], []>} : vector<8x40xf32>, vector<40x1xf32>, vector<8x1xf32> -> vector<8x1xf32>
    %c0_29 = arith.constant 0 : index
    %c0_30 = arith.constant 0 : index
    %43 = vector.load %arg13[%c0_29, %c0_30] : memref<1x1xf32, #tpu.memory_space<vmem>>, vector<1x1xf32>
    %44 = vector.broadcast %43 : vector<1x1xf32> to vector<8x1xf32>
    %45 = arith.addf %42, %44 : vector<8x1xf32>
    %46 = arith.index_cast %arg0 : i32 to index
    %47 = memref.load %arg2[%46] : memref<2xi32, #tpu.memory_space<smem>>
    %c8_i32 = arith.constant 8 : i32
    %48 = arith.muli %arg1, %c8_i32 : i32
    %49 = tpu.iota {dimensions = array<i32: 0>} : vector<8x1xi32>
    %50 = vector.broadcast %48 : i32 to vector<8x1xi32>
    %51 = arith.addi %50, %49 : vector<8x1xi32>
    %52 = vector.broadcast %47 : i32 to vector<8x1xi32>
    %53 = arith.cmpi slt, %51, %52 : vector<8x1xi32>
    %cst_31 = arith.constant 0.000000e+00 : f32
    %54 = vector.broadcast %cst_31 : f32 to vector<8x1xf32>
    %55 = arith.select %53, %45, %54 : vector<8x1xi1>, vector<8x1xf32>
    %c0_32 = arith.constant 0 : index
    %c0_33 = arith.constant 0 : index
    %56 = vector.load %arg15[%c0_32, %c0_33] : memref<1x4xf32, #tpu.memory_space<vmem>>, vector<1x4xf32>
    %57 = vector.broadcast %55 : vector<8x1xf32> to vector<8x4xf32>
    %58 = arith.mulf %57, %6 : vector<8x4xf32>
    %cst_34 = arith.constant dense<0.000000e+00> : vector<4xf32>
    %59 = vector.multi_reduction <add>, %58, %cst_34 [0] : vector<8x4xf32> to vector<4xf32>
    %60 = vector.shape_cast %59 : vector<4xf32> to vector<1x4xf32>
    %61 = arith.addf %56, %60 : vector<1x4xf32>
    %c0_35 = arith.constant 0 : index
    %c0_36 = arith.constant 0 : index
    %62 = vector.load %arg15[%c0_35, %c0_36] : memref<1x4xf32, #tpu.memory_space<vmem>>, vector<1x4xf32>
    tpu.vector_store %arg15[%c0_35, %c0_36], %61 {strides = array<i32>} : memref<1x4xf32, #tpu.memory_space<vmem>>, vector<1x4xf32>,
    %c0_i32_37 = arith.constant 0 : i32
    %63 = arith.cmpi eq, %arg1, %c0_i32_37 : i32
    %64 = arith.extui %63 : i1 to i32
    %c0_i32_38 = arith.constant 0 : i32
    %65 = arith.cmpi ne, %64, %c0_i32_38 : i32
    scf.if %65 {
      %c0_39 = arith.constant 0 : index
      %c0_40 = arith.constant 0 : index
      %66 = vector.load %arg15[%c0_39, %c0_40] : memref<1x4xf32, #tpu.memory_space<vmem>>, vector<1x4xf32>
      %c0_41 = arith.constant 0 : index
      %c0_42 = arith.constant 0 : index
      %c0_43 = arith.constant 0 : index
      %67 = vector.load %arg14[%c0_41, %c0_42, %c0_43] : memref<1x1x4xf32, #tpu.memory_space<vmem>>, vector<1x1x4xf32>
      %68 = vector.shape_cast %67 : vector<1x1x4xf32> to vector<1x4xf32>
      %69 = vector.shape_cast %66 : vector<1x4xf32> to vector<1x1x4xf32>
      tpu.vector_store %arg14[%c0_41, %c0_42, %c0_43], %69 {strides = array<i32>} : memref<1x1x4xf32, #tpu.memory_space<vmem>>, vector<1x1x4xf32>,
    } else {
    }
    return
  }
  func.func @transform_0(%arg0: i32, %arg1: i32, %arg2: memref<2xi32, #tpu.memory_space<smem>>) -> (i32, i32, i32) {
    %c0_i32 = arith.constant 0 : i32
    %c0_i32_0 = arith.constant 0 : i32
    %c0_i32_1 = arith.constant 0 : i32
    return %arg0, %c0_i32, %c0_i32_0 : i32, i32, i32
  }
  func.func @transform_1(%arg0: i32, %arg1: i32, %arg2: memref<2xi32, #tpu.memory_space<smem>>) -> (i32, i32, i32) {
    %c0_i32 = arith.constant 0 : i32
    %c0_i32_0 = arith.constant 0 : i32
    return %arg0, %arg1, %c0_i32 : i32, i32, i32
  }
  func.func @transform_2(%arg0: i32, %arg1: i32, %arg2: memref<2xi32, #tpu.memory_space<smem>>) -> (i32, i32) {
    %c0_i32 = arith.constant 0 : i32
    %c0_i32_0 = arith.constant 0 : i32
    %c0_i32_1 = arith.constant 0 : i32
    return %c0_i32, %c0_i32_0 : i32, i32
  }
  func.func @transform_3(%arg0: i32, %arg1: i32, %arg2: memref<2xi32, #tpu.memory_space<smem>>) -> (i32, i32) {
    %c0_i32 = arith.constant 0 : i32
    %c0_i32_0 = arith.constant 0 : i32
    %c0_i32_1 = arith.constant 0 : i32
    return %c0_i32, %c0_i32_0 : i32, i32
  }
  func.func @transform_4(%arg0: i32, %arg1: i32, %arg2: memref<2xi32, #tpu.memory_space<smem>>) -> (i32, i32) {
    %c0_i32 = arith.constant 0 : i32
    %c0_i32_0 = arith.constant 0 : i32
    %c0_i32_1 = arith.constant 0 : i32
    return %c0_i32, %c0_i32_0 : i32, i32
  }
  func.func @transform_5(%arg0: i32, %arg1: i32, %arg2: memref<2xi32, #tpu.memory_space<smem>>) -> (i32, i32) {
    %c0_i32 = arith.constant 0 : i32
    %c0_i32_0 = arith.constant 0 : i32
    %c0_i32_1 = arith.constant 0 : i32
    return %c0_i32, %c0_i32_0 : i32, i32
  }
  func.func @transform_6(%arg0: i32, %arg1: i32, %arg2: memref<2xi32, #tpu.memory_space<smem>>) -> (i32, i32) {
    %c0_i32 = arith.constant 0 : i32
    %c0_i32_0 = arith.constant 0 : i32
    %c0_i32_1 = arith.constant 0 : i32
    return %c0_i32, %c0_i32_0 : i32, i32
  }
  func.func @transform_7(%arg0: i32, %arg1: i32, %arg2: memref<2xi32, #tpu.memory_space<smem>>) -> (i32, i32) {
    %c0_i32 = arith.constant 0 : i32
    %c0_i32_0 = arith.constant 0 : i32
    %c0_i32_1 = arith.constant 0 : i32
    return %c0_i32, %c0_i32_0 : i32, i32
  }
  func.func @transform_8(%arg0: i32, %arg1: i32, %arg2: memref<2xi32, #tpu.memory_space<smem>>) -> (i32, i32) {
    %c0_i32 = arith.constant 0 : i32
    %c0_i32_0 = arith.constant 0 : i32
    %c0_i32_1 = arith.constant 0 : i32
    return %c0_i32, %c0_i32_0 : i32, i32
  }
  func.func @transform_9(%arg0: i32, %arg1: i32, %arg2: memref<2xi32, #tpu.memory_space<smem>>) -> (i32, i32) {
    %c0_i32 = arith.constant 0 : i32
    %c0_i32_0 = arith.constant 0 : i32
    %c0_i32_1 = arith.constant 0 : i32
    return %c0_i32, %c0_i32_0 : i32, i32
  }
  func.func @transform_10(%arg0: i32, %arg1: i32, %arg2: memref<2xi32, #tpu.memory_space<smem>>) -> (i32, i32) {
    %c0_i32 = arith.constant 0 : i32
    %c0_i32_0 = arith.constant 0 : i32
    %c0_i32_1 = arith.constant 0 : i32
    return %c0_i32, %c0_i32_0 : i32, i32
  }
  func.func @transform_11(%arg0: i32, %arg1: i32, %arg2: memref<2xi32, #tpu.memory_space<smem>>) -> (i32, i32, i32) {
    %c0_i32 = arith.constant 0 : i32
    %c0_i32_0 = arith.constant 0 : i32
    %c0_i32_1 = arith.constant 0 : i32
    return %arg0, %c0_i32, %c0_i32_0 : i32, i32, i32
  }
}

</mosaic_0001>

<bundles_post_ra>
// kernel: tpu_custom_call.1
= control target key start
LH: loop header
LB: loop body
LE: loop exit
PB: predicated region body
PF: predicated region fallthrough
CT: control target
= control target key end

     0   :  { %s1660_s0 = inlined_call_operand.vmem [shape: s32[2], index: 0, kind: input, shape index: {}]   ;;  %s1661_s1 = inlined_call_operand.vmem [shape: f32[2,1,4], index: 1, kind: input, shape index: {}]   ;;  %s1662_s2 = inlined_call_operand.vmem [shape: f32[2,8,4], index: 2, kind: input, shape index: {}]   ;;  %s1663_s3 = inlined_call_operand.vmem [shape: f32[4,80], index: 3, kind: input, shape index: {}]   ;;  %s1664_s4 = inlined_call_operand.vmem [shape: f32[4,80], index: 4, kind: input, shape index: {}]   ;;  %s1665_s5 = inlined_call_operand.vmem [shape: f32[4,80], index: 5, kind: input, shape index: {}]   ;;  %s1666_s6 = inlined_call_operand.vmem [shape: f32[4,80], index: 6, kind: input, shape index: {}]   ;;  %s1667_s7 = inlined_call_operand.vmem [shape: f32[1,80], index: 7, kind: input, shape index: {}]   ;;  %s1668_s8 = inlined_call_operand.vmem [shape: f32[80,40], index: 8, kind: input, shape index: {}]   ;;  %s1669_s9 = inlined_call_operand.vmem [shape: f32[1,40], index: 9, kind: input, shape index: {}]   ;;  %s1670_s10 = inlined_call_operand.vmem [shape: f32[40,1], index: 10, kind: input, shape index: {}]   ;;  %s1671_s12 = inlined_call_operand.hbm [shape: f32[2,1,4], index: 12, kind: output, shape index: {}]   ;;  %s1672_s11 = inlined_call_operand.<no memory space> [shape: f32[1,1], index: 11, kind: input, shape index: {}]  }
   0x1   :  { %s17_s23 = sshll.u32 %s1660_s0, 4  ;;  %v21_v0 = vstv %s1672_s11  ;;  %s18_s23 = int_to_ptr.vmem [resolvable:$true] %s17_s23 }
   0x2   :  { %22 = vst [vmem:[#allocation5] sm:$0x1] %v21_v0  ;;  %s1270_s26 = scalar_lea.vmem %s18_s23, 16  ;;  %p1275_p1 = scmp.lt.s32.totalorder %s18_s23, %s18_s23 }
   0x3   :  { %p1271_p0 = scmp.ne.s32.totalorder %s18_s23, %s1270_s26  ;;  %p1276_p2 = scmp.lt.s32.totalorder %s1270_s26, %s1270_s26 }
   0x5   :  { %p1277_p3 = por %p1276_p2, %p1275_p1 }
   0x7   :  { %p1278_p4 = pnand %p1277_p3, %p1271_p0 }
   0x9   :  { %1281 = shalt.err (!%p1278_p4)  }
   0xa   :  { %s1364_s27 = smov [#allocation4]  }
   0xb   :  { %20 = dma.vmem_to_smem %s18_s23, 16, %s1364_s27, [#allocation3] }
   0xc   :  { %1334 = dma.done.wait [#allocation3], 16 }
   0xd   :  { %1335 = vsyncadd [#allocation3], 4294967280 }
   0xe   :  { %24 = sfence }
   0xf   :  { %25 = vsyncpa [#allocation7], 0 }
  0x10   :  { %27 = vsyncpa [#allocation7 + $0x1], 0  ;;  %s1441_s0 = smov 0   ;;  %s1443_s28 = smov 0  }
  0x11   :  { %s1445_s11 = smov 0   ;;  %s1447_s29 = smov 0  }
  0x12   :  { %s1449_s30 = smov 0   ;;  %s1451_s13 = smov 0  }
  0x13 LB: > { %s1075_s14 = sadd.s32 4294967295, %s1362_s13   ;;  %s1076_s15 = sadd.s32 4294967294, %s1362_s13   ;;  %s1362_s13 = sphi %s1451_s13, %s33_s13   ;;  %s1358_s30 = sphi %s1449_s30, %s1679_s30   ;;  %s1354_s29 = sphi %s1447_s29, %s1678_s29   ;;  %s1350_s11 = sphi %s1445_s11, %s1677_s11   ;;  %s1346_s28 = sphi %s1443_s28, %s1676_s28   ;;  %s1342_s0 = sphi %s1441_s0, %s1675_s0  }
  0x14   : > { %s45_s16 = sadd.s32 1, %s1358_s30  ;;  %s295_s17 = sadd.s32 1, %s1350_s11 }
  0x15   : > { %p47_p5 = scmp.ge.s32.totalorder %s45_s16, 2  ;;  %p305_p6 = scmp.ne.s32.totalorder %s1350_s11, %s1346_s28 }
  0x16   : > { %p306_p7 = scmp.eq.s32.totalorder %s1075_s14, 1  ;;  %p311_p8 = scmp.ne.s32.totalorder %s1346_s28, %s1342_s0 }
  0x17   : > { %s1681_s16 = smov (%p47_p5, %s45_s16), 0  ;;  %p312_p10 = scmp.eq.s32.totalorder %s1076_s15, 1 }
  0x18   : > { %p1481_p9 = por %p306_p7, %p305_p6  ;;  %s292_s19 = ssub.s32 %s1358_s30, %s1681_s16 }
  0x19   : > { %p1079_p11 = scmp.ge.s32.totalorder %s1362_s13, 1  ;;  %p293_p12 = scmp.eq.s32.totalorder %s292_s19, 0 }
  0x1a   : > { %p1488_p13 = por %p312_p10, %p311_p8  ;;  %p373_p0 = scmp.lt.s32.totalorder %s1362_s13, 3 }
  0x1b   : > { %s1494_s21 = scalar_select %p293_p12, %s1350_s11, %s295_s17  }
  0x1c   : > { %p374_p1 = pnand %p1079_p11, %p373_p0 }
  0x1d   : > { %v435_v1 = vld [vmem:[%s1663_s3] sm:$0xf] (!%p374_p1)  ;;  %vm440_vm0 = vcmask (!%p374_p1), 1043456   ;;  %p417_p2 = scmp.lt.s32.totalorder (!%p374_p1), %s1354_s29, 1  ;;  %v591_v2 = vlaneseq (!%p374_p1)  ;;  %v1365_v3 = vmov (!%p374_p1), 0.0   ;;  %vm1366_vm1 = vmmov (!%p374_p1), 0  }
  0x1e   : > { %377 = sbr.rel (%p374_p1) target bundleno = 913 (0x391), region = 64  ;;  %1124 = vmatprep.subr.mxu1 (!%p374_p1), %v1365_v3  ;;  %1126 = vmatprep.mubr.msk.f32.mxu1 (!%p374_p1), %vm1366_vm1, %v1365_v3  ;;  %v597_v4 = vld [vmem:[%s1665_s5] sm:$0xf] (!%p374_p1)  ;;  %vm436_vm2 = vcmask (!%p374_p1), 31744   ;;  %v774_v15 = vld [vmem:[%s1668_s8 + $0x8] sm:$0xff] (!%p374_p1)  ;;  %v1367_v17 = vmov (!%p374_p1), 0.0|0.0  }
  0x1f   : > { %1125 = vmatpush3.msk.msra.mxu1 (!%p374_p1), %vm440_vm0, %v435_v1  ;;  %v1508_v5 = vshrl.u32 (!%p374_p1), %v591_v2, 7  ;;  %1134 = vmatprep.subr.mxu0 (!%p374_p1), %v1365_v3  ;;  %v514_v7 = vld [vmem:[%s1664_s4] sm:$0xf] (!%p374_p1)  ;;  %v775_v18 = vld [vmem:[%s1668_s8 + $0x10] sm:$0xff] (!%p374_p1)  ;;  %v776_v19 = vld [vmem:[%s1668_s8 + $0x18] sm:$0xff] (!%p374_p1)  ;;  %vm790_vm3 = vcmask (!%p374_p1), 654336  }
  0x20   : > { %1129 = vmatprep.subr.mxu1 (!%p374_p1), %v1365_v3  ;;  %1135 = vmatpush3.msk.msra.mxu0 (!%p374_p1), %vm440_vm0, %v597_v4  ;;  %v675_v11 = vld [vmem:[%s1666_s6] sm:$0xf] (!%p374_p1)  ;;  %v1184_v20 = vpack.c.bf16 (!%p374_p1), %v776_v19, %v775_v18  ;;  %v778_v22 = vld [vmem:[%s1668_s8 + $0x28] sm:$0xff] (!%p374_p1)  ;;  %v779_v24 = vld [vmem:[%s1668_s8 + $0x30] sm:$0xff] (!%p374_p1)  ;;  %vm882_vm4 = vcmask (!%p374_p1), 326656   ;;  %v1368_v63 = vmov (!%p374_p1), 0  }
  0x21   : > { %v593_v6 = vsub.s32 (!%p374_p1), 0, %v1508_v5  ;;  %1136 = vmatprep.mubr.msk.f32.mxu0 (!%p374_p1), %vm1366_vm1, %v1365_v3  ;;  %v773_v14 = vld [vmem:[%s1668_s8] sm:$0xff] (!%p374_p1)  ;;  %1180 = vmatprep.subr.bf16.mxu0 (!%p374_p1), %v1367_v17  ;;  %v780_v25 = vld [vmem:[%s1668_s8 + $0x38] sm:$0xff] (!%p374_p1)  ;;  %v782_v28 = vld [vmem:[%s1668_s8 + $0x48] sm:$0xff] (!%p374_p1)  ;;  %vm431_vm6 = vcmask (!%p374_p1), 24576   ;;  %s415_s23 = sand.u32 (!%p374_p1), 1, %s1346_s28  }
  0x22   : > { %v1181_v16 = vpack.c.bf16 (!%p374_p1), %v774_v15, %v773_v14  ;;  %v777_v21 = vld [vmem:[%s1668_s8 + $0x20] sm:$0xff] (!%p374_p1)  ;;  %v1190_v26 = vpack.c.bf16 (!%p374_p1), %v780_v25, %v779_v24  ;;  %v871_v49 = vld [vmem:[%s1670_s10 + $0x8] sm:$0xff] (!%p374_p1)  ;;  %v872_v51 = vld [vmem:[%s1670_s10 + $0x10] sm:$0xff] (!%p374_p1)  ;;  %1261 = vset.pattern.permute.xlu0 (!%p374_p1), %v1368_v63  ;;  %432 = vst.msk [vmem:[#allocation2] sm:$0x1] (!%p374_p1), %vm431_vm6, %v1365_v3  ;;  %s1096_s24 = sshll.u32 (!%p374_p1), %s1354_s29, 4 }
  0x23   : > { %v1187_v23 = vpack.c.bf16 (!%p374_p1), %v778_v22, %v777_v21  ;;  %v781_v27 = vld [vmem:[%s1668_s8 + $0x40] sm:$0xff] (!%p374_p1)  ;;  %v873_v52 = vld [vmem:[%s1670_s10 + $0x18] sm:$0xff] (!%p374_p1)  ;;  %s988_s17 = scalar_lea.sflag (!%p374_p1), [#allocation7], %s415_s23 }
  0x24   : > { %v1193_v29 = vpack.c.bf16 (!%p374_p1), %v782_v28, %v781_v27  ;;  %v1089_v40 = vld [vmem:[%s1667_s7] ss:$0 sm:$0xff] (!%p374_p1)  ;;  %v1199_v53 = vpack.c.bf16 (!%p374_p1), %v873_v52, %v872_v51  ;;  %v1094_v1 = vld [vmem:[#allocation5] ss:$0 sm:$0xff] (!%p374_p1) }
  0x25   : > { %s418_s26 = scalar_select %p417_p2, %s1354_s29, 1  ;;  %v870_v48 = vld [vmem:[%s1670_s10] sm:$0xff] }
  0x26   : > { %v1196_v50 = vpack.c.bf16 %v871_v49, %v870_v48  ;;  %v874_v54 = vld [vmem:[%s1670_s10 + $0x20] sm:$0xff] }
  0x27   : > { %s419_s15 = scalar_lea.vmem %s1661_s1, %s418_s26  ;;  %s1080_s22 = sshll.u32 %s418_s26, 3  ;;  %v1091_v55 = vld [vmem:[%s1669_s9] ss:$0 sm:$0xff] }
  0x28   : > { %v433_v8 = vld [vmem:[%s419_s15] sm:$0x1]  ;;  %s426_s25 = scalar_lea.vmem %s1662_s2, %s1080_s22  ;;  %s956_s22 = sld [smem:[#allocation4 + %s1354_s29]] }
  0x29   : > { %1127 = vmatmul.mubr.msk.f32.vlgmr.msra.gmra.mrb[0].mxu1 %vm436_vm2, %v433_v8  ;;  %v594_v9 = vrot.slane %v433_v8, %v593_v6  ;;  %v1526_v10 = vld [vmem:[%s426_s25] sm:$0xff]  ;;  %s416_s25 = scalar_lea.vmem [#allocation6], %s415_s23  ;;  %s1612_s15 = scalar_lea.hbm %s1671_s12, %s1096_s24 }
  0x2a   : > { %1130 = vmatpush3.msk.msra.mxu1 %vm440_vm0, %v514_v7  ;;  %1131 = vmatprep.mubr.msk.f32.mxu1 %vm1366_vm1, %v1365_v3  ;;  %s1000_s26 = sshll.u32 %s416_s25, 4  ;;  %s1369_s29 = smov [#allocation6]   ;;  %s1614_s26 = int_to_ptr.vmem [resolvable:$true] %s1000_s26 }
  0x2b   : > { %1139 = vmatprep.subr.mxu1 %v1365_v3  ;;  %v596_v12 = vsub.f32 %v594_v9, %v1526_v10  ;;  %v674_v13 = vmul.f32 %v594_v9, %v1526_v10  ;;  %s1282_s19 = scalar_lea.vmem %s1614_s26, 16 }
  0x2c   : > { %p1283_p3 = scmp.ne.s32.totalorder %s1614_s26, %s1282_s19 }
  0x2d   : > { %1132 = vmatmul.mubr.msk.f32.vlgmr.msra.gmra.mrb[2].mxu1 %vm436_vm2, %v1526_v10  ;;  %1137 = vmatmul.mubr.msk.f32.vlgmr.msra.gmra.mrb[0].mxu0 %vm436_vm2, %v596_v12 }
  0x2e   : > { %1140 = vmatpush3.msk.msra.mxu1 %vm440_vm0, %v675_v11  ;;  %1141 = vmatprep.mubr.msk.f32.mxu1 %vm1366_vm1, %v1365_v3  ;;  %v962_v0 = vstv %s956_s22  ;;  %p1284_p4 = pnand %p1283_p3, %p1481_p9  ;;  %s1286_s22 = sshll.u32 %s1369_s29, 4  ;;  %s1287_s22 = int_to_ptr.vmem [resolvable:$false] %s1286_s22 }
  0x2f   : > { %1164 = vmatprep.mubr.msk.f32.mxu0 %vm1366_vm1, %v1365_v3  ;;  %1195 = vmatprep.subr.bf16.mxu1 %v1367_v17  ;;  %vm963_vm5 = vcmp.lt.s32.totalorder %v1508_v5, %v962_v0  ;;  %s1288_s27 = scalar_lea.vmem %s1287_s22, 32  ;;  %p1289_p6 = scmp.lt.s32.totalorder %s1614_s26, %s1287_s22 }
  0x30   : > { %1182 = vmatpush3.bf16.msra.mxu0 %v1181_v16  ;;  %v965_v16 = vld [vmem:[#allocation2] sm:$0x1]  ;;  %p1285_p5 = pneg %p1284_p4  ;;  %p1290_p7 = scmp.lt.s32.totalorder %s1288_s27, %s1282_s19 }
  0x31   : > { %1142 = vmatmul.mubr.msk.f32.vlgmr.msra.gmra.mrb[4].mxu1 %vm436_vm2, %v674_v13  ;;  %1183 = vmatprep.subr.bf16.mxu0 %v1367_v17 }
  0x32   : > { %1177 = vmatprep.mubr.msk.f32.mxu1 %vm1366_vm1, %v1365_v3  ;;  %1197 = vmatpush3.bf16.msra.mxu1 %v1196_v50  ;;  %p1291_p8 = por %p1290_p7, %p1289_p6 }
  0x33   : > { %1198 = vmatprep.subr.bf16.mxu1 %v1367_v17 }
  0x34   : > { %1185 = vmatpush3.bf16.msra.mxu0 %v1184_v20  ;;  %p1292_p10 = pnand %p1291_p8, %p1285_p5 }
  0x35   : > { %1186 = vmatprep.subr.bf16.mxu0 %v1367_v17 }
  0x36   : > { %1200 = vmatpush3.bf16.msra.mxu1 %v1199_v53 }
  0x37   : > { %1175 = vmatprep.subr.mxu1 %v1365_v3 }
  0x38   : > { %1188 = vmatpush3.bf16.msra.mxu0 %v1187_v23 }
  0x39   : > { %1189 = vmatprep.subr.bf16.mxu0 %v1367_v17 }
  0x3a   : > { %1176 = vmatpush3.msra.mxu1 %v874_v54 }
  0x3c   : > { %1191 = vmatpush3.bf16.msra.mxu0 %v1190_v26 }
  0x3d   : > { %1192 = vmatprep.subr.bf16.mxu0 %v1367_v17 }
  0x40   : > { %1194 = vmatpush3.bf16.msra.mxu0 %v1193_v29 }
  0xfc   : > { %v510_v30 = vpop.f32.mrb[0].mxu1 }
  0xfd   : > { %v1128_v31 = vpop.f32.mrb[1].mxu1  ;;  %v755_v32 = vrot.slane %v510_v30, %v593_v6 }
 0x100   : > { %v587_v33 = vpop.f32.mrb[2].mxu1  ;;  %v670_v34 = vpop.f32.mrb[0].mxu0 }
 0x101   : > { %v756_v35 = vadd.f32 %v755_v32, %v587_v33  ;;  %v1133_v36 = vpop.f32.mrb[3].mxu1  ;;  %v1138_v37 = vpop.f32.mrb[1].mxu0 }
 0x103   : > { %v757_v38 = vadd.f32 %v756_v35, %v670_v34 }
 0x104   : > { %v748_v39 = vpop.f32.mrb[4].mxu1 }
 0x105   : > { %v758_v41 = vadd.f32 %v757_v38, %v748_v39  ;;  %v1143_v42 = vpop.f32.mrb[5].mxu1 }
 0x107   : > { %v766_v43 = vadd.f32 %v1089_v40, %v758_v41 }
 0x109   : > { %v1090_v44 = vmul.f32 -1.442695, %v766_v43 }
 0x10b   : > { %1262 = vpow2.f32 %v1090_v44 }
 0x115   : > { %v1263_v45 = vpop.eup %1262 }
 0x116   : > { %v770_v46 = vadd.f32 1.0, %v1263_v45 }
 0x118   : > { %1264 = vrcp.f32 %v770_v46 }
 0x122   : > { %v1265_v47 = vpop.eup %1264 }
 0x123   : > { %1165 = vmatmul.mubr.msk.f32.vlgmr.msra.gmra.mrb[2].mxu0 %vm790_vm3, %v1265_v47 }
 0x1f6   : > { %v860_v56 = vpop.f32.mrb[2].mxu0 }
 0x1f7   : > { %v861_v57 = vadd.f32 %v1091_v55, %v860_v56  ;;  %v1166_v58 = vpop.f32.mrb[3].mxu0 }
 0x1f9   : > { %v1093_v59 = vmul.f32 -1.442695, %v861_v57 }
 0x1fb   : > { %1266 = vpow2.f32 %v1093_v59 }
 0x205   : > { %v1267_v60 = vpop.eup %1266 }
 0x206   : > { %v867_v61 = vadd.f32 1.0, %v1267_v60 }
 0x208   : > { %1268 = vrcp.f32 %v867_v61 }
 0x212   : > { %v1269_v62 = vpop.eup %1268 }
 0x213   : > { %1178 = vmatmul.mubr.msk.f32.vlgmr.msra.gmra.mrb[6].mxu1 %vm882_vm4, %v1269_v62 }
 0x2e6   : > { %v952_v2 = vpop.f32.mrb[6].mxu1 }
 0x2e7   : > { %v953_v4 = vadd.f32 %v1094_v1, %v952_v2  ;;  %v1179_v6 = vpop.f32.mrb[7].mxu1 }
 0x2e9   : > { %v964_v7 = vsel %vm963_vm5, %v953_v4, 0.0 }
 0x2ea   : > { %968 = vperm.xlu0 %1261, %v964_v7  }
 0x369   : > { %v969_v8 = vpop.permute.xlu0 %968 }
 0x36a   : > { %v971_v9 = vmul.f32 %v969_v8, %v1526_v10 }
 0x36c   : > { %v972_v11 = vsel %vm436_vm2, %v971_v9, 0.0 }
 0x36d   : > { %v973_v12 = vrot.slane %v972_v11, 4 }
 0x36f   : > { %v974_v13 = vadd.f32 %v973_v12, %v972_v11 }
 0x371   : > { %v975_v14 = vrot.slane %v974_v13, 2 }
 0x373   : > { %v976_v15 = vadd.f32 %v975_v14, %v974_v13 }
 0x375   : > { %v977_v5 = vrot.slane %v976_v15, 1 }
 0x377   : > { %v978_v17 = vadd.f32 %v977_v5, %v976_v15 }
 0x379   : > { %v979_v18 = vadd.f32 %v978_v17, %v965_v16 }
 0x37b   : > { %981 = vst.msk [vmem:[#allocation2] sm:$0x1] %vm431_vm6, %v979_v18 }
 0x382   : > { %v985_v3 = vld [vmem:[#allocation2] sm:$0x1] }
 0x383   : > { %986 = vst.msk [vmem:[%s416_s25] sm:$0x1] %vm431_vm6, %v985_v3 }
 0x384   : > { %1295 = shalt.err (!%p1292_p10)
}
 0x385   : > { %s1296_s23 = scalar_lea.hbm %s1612_s15, 16  ;;  %s1300_s14 = scalar_lea.hbm %s1671_s12, 32 }
 0x386   : > { %p1297_p11 = scmp.ne.s32.totalorder %s1612_s15, %s1296_s23  ;;  %p1301_p1 = scmp.lt.u32.totalorder %s1612_s15, %s1671_s12 }
 0x387   : > { %p1302_p2 = scmp.lt.u32.totalorder %s1300_s14, %s1296_s23  ;;  %p1304_p4 = scmp.lt.u32.totalorder %s1296_s23, %s1612_s15 }
 0x388   : > { %p1298_p12 = pnand %p1297_p11, %p1481_p9 }
 0x389   : > { %p1303_p3 = por %p1302_p2, %p1301_p1 }
 0x38a   : > { %p1299_p0 = pneg %p1298_p12 }
 0x38b   : > { %p1305_p5 = por %p1304_p4, %p1303_p3 }
 0x38d   : > { %p1306_p6 = pnand %p1305_p5, %p1299_p0 }
 0x38f   : > { %1309 = shalt.err (!%p1306_p6)
}
 0x390   : > { %1201 = dma.vmem_to_hbm [thread:$0]  (%p1481_p9), %s1614_s26, 16, %s1612_s15, %s988_s17  }
 0x391 PF: > { %p1207_p7 = scmp.ge.s32.totalorder %s1362_s13, 2  ;;  %s1012_s19 = sand.u32 1, %s1342_s0  }
 0x392   : > { %s1013_s27 = scalar_lea.sflag [#allocation7], %s1012_s19 }
 0x393   : > { %p1204_p8 = pnand %p1207_p7, %p1488_p13 }
 0x395   : > { %1337 = dma.done.wait (!%p1204_p8), %s1013_s27, 16  }
 0x396   : > { %1339 = vsyncadd (!%p1204_p8), %s1013_s27, 4294967280  ;;  %s33_s13 = sadd.s32 1, %s1362_s13   ;;  %s1675_s0 = smov %s1346_s28 }
 0x397   : > { %p30_p10 = scmp.ge.s32.totalorder %s33_s13, 4   ;;  %s1676_s28 = smov %s1350_s11 }
 0x398   : > { %s1677_s11 = smov %s1494_s21  ;;  %s1678_s29 = smov %s1358_s30 }
 0x399   : > { %s1679_s30 = smov %s1681_s16  ;;  %32 = sbr.rel (!%p30_p10) target bundleno = 19 (0x13), region = 110 }
 0x3a0   :  { %1017 = vsyncpa [#allocation7], 1 }
 0x3a1   :  { %1019 = vsyncpa [#allocation7 + $0x1], 1 }

</bundles_post_ra>
